<compile_context>
chip_gen: v6e
topology: v6e:2x2x1
jax: 0.10.0
libtpu: 0.0.40
codegen_flags: <defaults>
</compile_context>

<pallas_src>
import jax
import jax.numpy as jnp
from jax.experimental import pallas as pl
from jax.experimental.pallas import tpu as pltpu


_LANES = 128
_SUBLANES = 8
# 2048 rows x 128 lanes x 4 B = 1 MiB per input block.
_MAX_TILE_ROWS = 2048


def _round_up(x: int, m: int) -> int:
    return ((x + m - 1) // m) * m


# ----------------------------------------------------------------------------
# 1. Forward pass (abstract in the PyTorch base class)
# ----------------------------------------------------------------------------
def model_forward(node_features: jax.Array) -> jax.Array:
    # TODO(synk): Model.forward is abstract (`pass`) in the reference module;
    # concrete subclasses implement the real GNN compute.  The identity
    # pass-through is returned directly instead of paying a full HBM
    # read + write inside a Pallas kernel for zero compute.
    return node_features


# ----------------------------------------------------------------------------
# 2. grad_norm: sqrt( sum over all parameters of sum(grad**2) )
# ----------------------------------------------------------------------------
def _sumsq_kernel(g_ref, o_ref):
    """One grid step: (block_rows, 128) tile -> (1, 8, 128) per-lane partial sums."""
    block_rows = g_ref.shape[0]          # static block shape
    sub = block_rows // _SUBLANES

    g = g_ref[...].astype(jnp.float32)   # cast in-kernel (no extra HBM copy)
    sq = g * g
    # Layout-preserving split of the sublane axis: (R,128) -> (R/8, 8, 128).
    # Reducing over axis 0 is pure per-lane VPU accumulation; the only
    # cross-lane reduce happens once, on tiny data, in the wrapper.
    partial = jnp.sum(sq.reshape(sub, _SUBLANES, _LANES), axis=0)
    o_ref[...] = partial.reshape(1, _SUBLANES, _LANES)


def _sum_sq_tensor(g: jax.Array) -> jax.Array:
    """Sum of squares of a single gradient tensor via a tiled Pallas kernel."""
    flat = jnp.ravel(g)                  # contiguous ravel: layout-preserving
    n = flat.shape[0]

    rows = -(-n // _LANES)               # ceil-div: rows of the (rows, 128) slab
    block_rows = min(_MAX_TILE_ROWS, _round_up(rows, _SUBLANES))
    padded_rows = _round_up(max(rows, 1), block_rows)
    padded_n = padded_rows * _LANES
    if padded_n != n:
        # Zero padding does not change the sum of squares.  Only the ragged
        # remainder forces this copy; exact-multiple tensors are untouched.
        # TODO(synk): a fully copy-free ragged path would need manual DMA with
        # memory_space=pl.ANY; not worth the complexity for a reduction.
        flat = jnp.pad(flat, (0, padded_n - n))
    slab = flat.reshape(padded_rows, _LANES)

    n_tiles = padded_rows // block_rows

    partials = pl.pallas_call(
        _sumsq_kernel,
        out_shape=jax.ShapeDtypeStruct((n_tiles, _SUBLANES, _LANES), jnp.float32),
        grid_spec=pltpu.PrefetchScalarGridSpec(
            num_scalar_prefetch=0,
            grid=(n_tiles,),
            in_specs=[pl.BlockSpec((block_rows, _LANES), lambda i: (i, 0))],
            out_specs=pl.BlockSpec((1, _SUBLANES, _LANES), lambda i: (i, 0, 0)),
        ),
        compiler_params=pltpu.CompilerParams(
            # Each tile writes its own output block and carries no state, so
            # the grid axis is truly parallel (lets v7x shard it across both
            # TensorCores; harmless on single-TC v5e/v6e).
            dimension_semantics=("parallel",),
        ),
    )(slab)

    # Tiny final cross-lane reduction (n_tiles * 8 * 128 floats).
    return jnp.sum(partials)


def model_grad_norm(grads) -> jax.Array:
    """Equivalent of Model.grad_norm(): global L2 norm over all gradient tensors."""
    total = jnp.float32(0.0)
    for g in grads:
        total = total + _sum_sq_tensor(g)
    return jnp.sqrt(total)


# ----------------------------------------------------------------------------
# main
# ----------------------------------------------------------------------------
if __name__ == "__main__":
    key = jax.random.PRNGKey(0)
    k_x, k_w, k_b, k_big = jax.random.split(key, 4)

    # Graph node features: 128 nodes, 32 features (small synthetic graph).
    x = jax.random.normal(k_x, (128, 32), dtype=jnp.float32)

    # Deterministic synthetic "parameter gradients" (the base class defines no
    # parameters itself; these stand in for an instantiated subclass).
    grad_w = jax.random.normal(k_w, (32, 64), dtype=jnp.float32) * 0.01         # lane-padded path
    grad_b = jax.random.normal(k_b, (64,), dtype=jnp.float32) * 0.01            # tiny / 1-row path
    grad_big = jax.random.normal(k_big, (1024, 512), dtype=jnp.float32) * 0.01  # multi-tile, no-pad path

    # Forward pass (abstract in the base class -> identity pass-through).
    y = model_forward(x)
    y = jax.block_until_ready(y)
    assert y.shape == x.shape and y.dtype == x.dtype

    # grad_norm reduction (the real compute in this module).
    grads = [grad_w, grad_b, grad_big]
    gnorm = jax.block_until_ready(model_grad_norm(grads))

    # Cross-check against plain JAX reference of the PyTorch semantics.
    ref = jnp.sqrt(sum(jnp.sum(g.astype(jnp.float32) ** 2) for g in grads))
    assert jnp.allclose(gnorm, ref, rtol=1e-5, atol=1e-6), (gnorm, ref)
    assert jnp.allclose(y, x)

    print("KERNEL_OK")
</pallas_src>

<mosaic_0001>
module attributes {stable_mosaic.version = 11 : i64} {
  func.func @_sumsq_kernel(%arg0: i32, %arg1: memref<16x128xf32, #tpu.memory_space<vmem>>, %arg2: memref<1x8x128xf32, #tpu.memory_space<vmem>>) attributes {dimension_semantics = [#tpu.dimension_semantics<parallel>], iteration_bounds = array<i64: 1>, scalar_prefetch = 0 : i64, scratch_operands = 0 : i64, tpu.core_type = #tpu.core_type<tc>, window_params = [{transform_indices = @transform_0, window_bounds = array<i64: 16, 128>}, {transform_indices = @transform_1, window_bounds = array<i64: 1, 8, 128>}]} {
    %c0 = arith.constant 0 : index
    %c0_0 = arith.constant 0 : index
    %0 = vector.load %arg1[%c0, %c0_0] : memref<16x128xf32, #tpu.memory_space<vmem>>, vector<16x128xf32>
    %1 = arith.mulf %0, %0 : vector<16x128xf32>
    %2 = vector.shape_cast %1 : vector<16x128xf32> to vector<2x8x128xf32>
    %cst = arith.constant dense<0.000000e+00> : vector<8x128xf32>
    %3 = vector.multi_reduction <add>, %2, %cst [0] : vector<2x8x128xf32> to vector<8x128xf32>
    %4 = vector.shape_cast %3 : vector<8x128xf32> to vector<1x8x128xf32>
    %c0_1 = arith.constant 0 : index
    %c0_2 = arith.constant 0 : index
    %c0_3 = arith.constant 0 : index
    %5 = vector.load %arg2[%c0_1, %c0_2, %c0_3] : memref<1x8x128xf32, #tpu.memory_space<vmem>>, vector<1x8x128xf32>
    tpu.vector_store %arg2[%c0_1, %c0_2, %c0_3], %4 {strides = array<i32>} : memref<1x8x128xf32, #tpu.memory_space<vmem>>, vector<1x8x128xf32>,
    return
  }
  func.func @transform_0(%arg0: i32) -> (i32, i32) {
    %c0_i32 = arith.constant 0 : i32
    %c0_i32_0 = arith.constant 0 : i32
    return %arg0, %c0_i32 : i32, i32
  }
  func.func @transform_1(%arg0: i32) -> (i32, i32, i32) {
    %c0_i32 = arith.constant 0 : i32
    %c0_i32_0 = arith.constant 0 : i32
    %c0_i32_1 = arith.constant 0 : i32
    return %arg0, %c0_i32, %c0_i32_0 : i32, i32, i32
  }
}

</mosaic_0001>

<bundles_post_ra>
// kernel: tpu_custom_call.1
= control target key start
LH: loop header
LB: loop body
LE: loop exit
PB: predicated region body
PF: predicated region fallthrough
CT: control target
= control target key end

     0   :  { %6 = vsyncpa [#allocation3], 0  ;;  %s112_s0 = inlined_call_operand.hbm [shape: f32[16,128], index: 0, kind: input, shape index: {}]   ;;  %s113_s1 = inlined_call_operand.hbm [shape: f32[1,8,128], index: 1, kind: output, shape index: {}]  }
   0x1   :  { %7 = vsyncpa [#allocation4], 0  ;;  %s92_s6 = smov [#allocation2]  }
   0x2   :  { %s13_s7 = sshll.u32 %s92_s6, 4  ;;  %s14_s7 = int_to_ptr.vmem [resolvable:$true] %s13_s7 }
   0x3   :  { %s56_s8 = scalar_lea.vmem %s14_s7, 256  ;;  %p61_p1 = scmp.lt.s32.totalorder %s14_s7, %s14_s7 }
   0x4   :  { %p57_p0 = scmp.ne.s32.totalorder %s14_s7, %s56_s8  ;;  %p62_p2 = scmp.lt.s32.totalorder %s56_s8, %s56_s8 }
   0x6   :  { %p63_p3 = por %p62_p2, %p61_p1 }
   0x8   :  { %p64_p4 = pnand %p63_p3, %p57_p0 }
   0xa   :  { %67 = shalt.err (!%p64_p4)
}
   0xb   :  { %s93_s9 = smov 128   ;;  %s94_s10 = smov 8  }
   0xc   :  { %19 = dma.hbm_to_vmem [thread:$0]  %s112_s0, 256, %s14_s7, [#allocation3], %s93_s9, %s93_s9, %s94_s10  }
   0xd   :  { %88 = dma.done.wait [#allocation3], 256  }
   0xe   :  { %89 = vsyncadd [#allocation3], 4294967040  ;;  %v23_v0 = vld [vmem:[#allocation2] sm:$0xff]  ;;  %v24_v1 = vld [vmem:[#allocation2 + $0x8] sm:$0xff]  ;;  %s95_s13 = smov [#allocation5]  }
   0xf   :  { %s35_s14 = sshll.u32 %s95_s13, 4  ;;  %v25_v2 = vmul.f32 %v23_v0, %v23_v0  ;;  %v26_v3 = vmul.f32 %v24_v1, %v24_v1  ;;  %s36_s14 = int_to_ptr.vmem [resolvable:$true] %s35_s14 }
  0x10   :  { %s68_s15 = scalar_lea.vmem %s36_s14, 128  ;;  %p73_p6 = scmp.lt.s32.totalorder %s36_s14, %s36_s14 }
  0x11   :  { %v27_v4 = vadd.f32 %v26_v3, %v25_v2  ;;  %p69_p5 = scmp.ne.s32.totalorder %s36_s14, %s68_s15  ;;  %p74_p7 = scmp.lt.s32.totalorder %s68_s15, %s68_s15 }
  0x13   :  { %28 = vst [vmem:[#allocation5] sm:$0xff] %v27_v4  ;;  %p75_p8 = por %p74_p7, %p73_p6 }
  0x15   :  { %p76_p9 = pnand %p75_p8, %p69_p5 }
  0x17   :  { %79 = shalt.err (!%p76_p9)
}
  0x18   :  { %38 = dma.vmem_to_hbm [thread:$0]  %s36_s14, 128, %s113_s1, [#allocation4]  }
  0x19   :  { %90 = dma.done.wait [#allocation4], 128  }
  0x1a   :  { %91 = vsyncadd [#allocation4], 4294967168 }
  0x1b   :  { %42 = vsyncpa [#allocation3], 1 }
  0x1c   :  { %43 = vsyncpa [#allocation4], 1 }

</bundles_post_ra>
